<compile_context>
chip_gen: v6e
topology: v6e:2x2x1
jax: 0.10.0
libtpu: 0.0.40
codegen_flags: <defaults>
</compile_context>

<pallas_src>
import jax
import jax.numpy as jnp
from jax.experimental import pallas as pl
from jax.experimental.pallas import tpu as pltpu


def _normalize_kernel(x_ref, mean_ref, inv_std_ref, o_ref):
    # x_ref / o_ref:          (rows_tile, cols_tile)  -- current block
    # mean_ref / inv_std_ref: (rows_tile, 1) float32  -- per-block stats column
    x = x_ref[...].astype(jnp.float32)
    y = (x - mean_ref[...]) * inv_std_ref[...]
    o_ref[...] = y.astype(o_ref.dtype)


def normalize_by_channel_mean_std(x, mean, std, *, block_bytes=4 << 20):
    """Pallas equivalent of normalize_fn(tensor, mean, std) for NCHW input.

    `block_bytes` is the per-step x-block budget.  4 MiB is a good default for
    v5e/v6e; on v7x (3.2 TB/s HBM) 8-12 MiB amortizes per-step overhead better.
    """
    N, C, H, W = x.shape
    NC, HW = N * C, H * W
    dtype = x.dtype
    itemsize = jnp.dtype(dtype).itemsize
    # PyTorch's .div() promotes integer tensors; keep float output for ints.
    out_dtype = dtype if jnp.issubdtype(dtype, jnp.floating) else jnp.float32
    out_itemsize = jnp.dtype(out_dtype).itemsize

    # Sublane packing: 8 rows for 32-bit, 16 for 16-bit, 32 for 8-bit dtypes.
    sublane = max(8, 32 // itemsize)
    rows_cap = int(pl.cdiv(NC, sublane) * sublane)

    if sublane * HW * itemsize <= block_bytes:
        # Case A: full-HW lane-dense row blocks (one DMA per row-block).
        cols_tile = HW
        rows_tile = (block_bytes // max(1, HW * itemsize)) // sublane * sublane
        rows_tile = int(min(max(sublane, rows_tile), rows_cap))
    else:
        # Case B: large images -- also tile HW in 128-lane multiples so a
        # single sublane-high block never exceeds the VMEM budget.
        rows_tile = int(sublane)
        cols_cap = int(pl.cdiv(HW, 128) * 128)
        cols_tile = (block_bytes // (sublane * itemsize)) // 128 * 128
        cols_tile = int(min(max(128, cols_tile), cols_cap))

    grid_rows = int(pl.cdiv(NC, rows_tile))
    grid_cols = int(pl.cdiv(HW, cols_tile))

    # v7x has 2 TensorCores sharing HBM bandwidth: make sure the "parallel"
    # grid has >= 2 blocks to shard whenever the problem is splittable.
    if grid_rows * grid_cols == 1:
        if rows_tile > sublane:
            rows_tile = int(max(sublane,
                                pl.cdiv(pl.cdiv(NC, sublane), 2) * sublane))
            grid_rows = int(pl.cdiv(NC, rows_tile))
        elif HW % 128 == 0 and HW >= 256:
            cols_tile = int(pl.cdiv(pl.cdiv(HW, 128), 2) * 128)
            grid_cols = int(pl.cdiv(HW, cols_tile))

    padded_nc = grid_rows * rows_tile
    x2 = x.reshape(NC, HW)

    # Stats stay in float32 regardless of x dtype (free: the kernel is
    # HBM-bound) and the divide is folded into a multiply by 1/std.
    mean_f = jnp.asarray(mean, jnp.float32).reshape(C)
    inv_std_f = 1.0 / jnp.asarray(std, jnp.float32).reshape(C)

    # Per-row columns (row r -> channel r % C), padded to padded_nc so the
    # last (possibly partial) row-block's stats fetch stays in bounds.
    mean_col = jnp.tile(mean_f, N)
    inv_col = jnp.tile(inv_std_f, N)
    pad = padded_nc - NC
    if pad:
        mean_col = jnp.concatenate([mean_col, jnp.zeros((pad,), jnp.float32)])
        inv_col = jnp.concatenate([inv_col, jnp.ones((pad,), jnp.float32)])
    mean_col = mean_col.reshape(padded_nc, 1)
    inv_col = inv_col.reshape(padded_nc, 1)

    # Scoped-VMEM budget: double-buffered in + out blocks, a possible f32
    # compute temporary for sub-f32 inputs, lane-padded stats columns, slack.
    block_elems = rows_tile * cols_tile
    f32_tmp = block_elems * 4 if dtype != jnp.dtype(jnp.float32) else 0
    stats_vmem = 2 * 2 * rows_tile * 128 * 4   # 2 arrays x 2 buffers, lane-pad
    vmem_limit = (2 * block_elems * (itemsize + out_itemsize)
                  + 2 * f32_tmp + stats_vmem + (2 << 20))
    vmem_limit = int(min(max(vmem_limit, 16 << 20), 56 << 20))

    cost = pl.CostEstimate(
        flops=2 * NC * HW,                                    # sub + mul
        bytes_accessed=NC * HW * (itemsize + out_itemsize) + 2 * NC * 4,
        transcendentals=0,
    )

    # TODO(synk): expose input_output_aliases={0: 0} if the caller can donate x
    # (halves the HBM footprint for large activations; traffic is unchanged).
    out2 = pl.pallas_call(
        _normalize_kernel,
        out_shape=jax.ShapeDtypeStruct((NC, HW), out_dtype),
        grid_spec=pltpu.PrefetchScalarGridSpec(
            num_scalar_prefetch=0,
            grid=(grid_rows, grid_cols),
            in_specs=[
                # Streaming x blocks (lane-dense along HW).
                pl.BlockSpec((rows_tile, cols_tile), lambda i, j: (i, j)),
                # Per-block stats columns: a few-KB DMA per step instead of a
                # VMEM-resident full-NC column.
                pl.BlockSpec((rows_tile, 1), lambda i, j: (i, 0)),
                pl.BlockSpec((rows_tile, 1), lambda i, j: (i, 0)),
            ],
            out_specs=pl.BlockSpec((rows_tile, cols_tile), lambda i, j: (i, j)),
        ),
        compiler_params=pltpu.CompilerParams(
            dimension_semantics=("parallel", "parallel"),
            vmem_limit_bytes=vmem_limit,
        ),
        cost_estimate=cost,
    )(x2, mean_col, inv_col)

    return out2.reshape(N, C, H, W)


if __name__ == "__main__":
    # Small deterministic example consistent with the module (per-channel
    # mean/std buffers of shape (C,), NCHW input).
    N, C, H, W = 2, 4, 16, 16
    key = jax.random.PRNGKey(0)

    x = jax.random.normal(key, (N, C, H, W), dtype=jnp.float32)
    mean = jnp.array([0.1, 0.2, 0.3, 0.4], dtype=jnp.float32)
    std = jnp.array([0.5, 0.6, 0.7, 0.8], dtype=jnp.float32)

    out = normalize_by_channel_mean_std(x, mean, std)
    out = jax.block_until_ready(out)

    # Reference (plain JAX, same semantics as the PyTorch normalize_fn).
    ref = (x - mean[None, :, None, None]) / std[None, :, None, None]
    assert out.shape == (N, C, H, W)
    assert out.dtype == x.dtype
    # (x - mean) * (1/std) in f32 differs from exact division by ~2 ULP.
    assert jnp.allclose(out, ref, atol=1e-6, rtol=1e-5)

    print("KERNEL_OK")
</pallas_src>

<mosaic_0001>
module attributes {stable_mosaic.version = 11 : i64} {
  func.func @_normalize_kernel(%arg0: i32, %arg1: i32, %arg2: memref<8x128xf32, #tpu.memory_space<vmem>>, %arg3: memref<8x1xf32, #tpu.memory_space<vmem>>, %arg4: memref<8x1xf32, #tpu.memory_space<vmem>>, %arg5: memref<8x128xf32, #tpu.memory_space<vmem>>) attributes {dimension_semantics = [#tpu.dimension_semantics<parallel>, #tpu.dimension_semantics<parallel>], iteration_bounds = array<i64: 1, 2>, scalar_prefetch = 0 : i64, scratch_operands = 0 : i64, tpu.core_type = #tpu.core_type<tc>, window_params = [{transform_indices = @transform_0, window_bounds = array<i64: 8, 128>}, {transform_indices = @transform_1, window_bounds = array<i64: 8, 1>}, {transform_indices = @transform_2, window_bounds = array<i64: 8, 1>}, {transform_indices = @transform_3, window_bounds = array<i64: 8, 128>}]} {
    %c0 = arith.constant 0 : index
    %c0_0 = arith.constant 0 : index
    %0 = vector.load %arg2[%c0, %c0_0] : memref<8x128xf32, #tpu.memory_space<vmem>>, vector<8x128xf32>
    %c0_1 = arith.constant 0 : index
    %c0_2 = arith.constant 0 : index
    %1 = vector.load %arg3[%c0_1, %c0_2] : memref<8x1xf32, #tpu.memory_space<vmem>>, vector<8x1xf32>
    %2 = vector.broadcast %1 : vector<8x1xf32> to vector<8x128xf32>
    %3 = arith.subf %0, %2 : vector<8x128xf32>
    %c0_3 = arith.constant 0 : index
    %c0_4 = arith.constant 0 : index
    %4 = vector.load %arg4[%c0_3, %c0_4] : memref<8x1xf32, #tpu.memory_space<vmem>>, vector<8x1xf32>
    %5 = vector.broadcast %4 : vector<8x1xf32> to vector<8x128xf32>
    %6 = arith.mulf %3, %5 : vector<8x128xf32>
    %c0_5 = arith.constant 0 : index
    %c0_6 = arith.constant 0 : index
    %7 = vector.load %arg5[%c0_5, %c0_6] : memref<8x128xf32, #tpu.memory_space<vmem>>, vector<8x128xf32>
    tpu.vector_store %arg5[%c0_5, %c0_6], %6 {strides = array<i32>} : memref<8x128xf32, #tpu.memory_space<vmem>>, vector<8x128xf32>,
    return
  }
  func.func @transform_0(%arg0: i32, %arg1: i32) -> (i32, i32) {
    %c0_i32 = arith.constant 0 : i32
    return %arg0, %arg1 : i32, i32
  }
  func.func @transform_1(%arg0: i32, %arg1: i32) -> (i32, i32) {
    %c0_i32 = arith.constant 0 : i32
    %c0_i32_0 = arith.constant 0 : i32
    return %arg0, %c0_i32 : i32, i32
  }
  func.func @transform_2(%arg0: i32, %arg1: i32) -> (i32, i32) {
    %c0_i32 = arith.constant 0 : i32
    %c0_i32_0 = arith.constant 0 : i32
    return %arg0, %c0_i32 : i32, i32
  }
  func.func @transform_3(%arg0: i32, %arg1: i32) -> (i32, i32) {
    %c0_i32 = arith.constant 0 : i32
    return %arg0, %arg1 : i32, i32
  }
}

</mosaic_0001>

<bundles_post_ra>
// kernel: tpu_custom_call.1
= control target key start
LH: loop header
LB: loop body
LE: loop exit
PB: predicated region body
PF: predicated region fallthrough
CT: control target
= control target key end

     0   :  { %8 = vsyncpa [#allocation3], 0  ;;  %s640_s0 = inlined_call_operand.vmem [shape: f32[8,256], index: 0, kind: input, shape index: {}]   ;;  %s641_s1 = inlined_call_operand.vmem [shape: f32[8,1], index: 1, kind: input, shape index: {}]   ;;  %s642_s2 = inlined_call_operand.vmem [shape: f32[8,1], index: 2, kind: input, shape index: {}]   ;;  %s643_s3 = inlined_call_operand.hbm [shape: f32[8,256], index: 3, kind: output, shape index: {}]  }
   0x1   :  { %10 = vsyncpa [#allocation3 + $0x1], 0  ;;  %s535_s12 = smov 0   ;;  %s537_s13 = smov 0  }
   0x2   :  { %s539_s14 = smov 0   ;;  %s541_s15 = smov 0  }
   0x3   :  { %s543_s16 = smov 0   ;;  %s545_s17 = smov 0  }
   0x4 LB: > { %s365_s18 = sadd.s32 4294967295, %s511_s17   ;;  %s366_s19 = sadd.s32 4294967294, %s511_s17   ;;  %s511_s17 = sphi %s545_s17, %s16_s17   ;;  %s507_s16 = sphi %s543_s16, %s650_s16   ;;  %s503_s15 = sphi %s541_s15, %s649_s15   ;;  %s499_s14 = sphi %s539_s14, %s648_s14   ;;  %s495_s13 = sphi %s537_s13, %s647_s13   ;;  %s491_s12 = sphi %s535_s12, %s646_s12  }
   0x5   : > { %s25_s20 = sadd.s32 1, %s507_s16  ;;  %s117_s21 = sadd.s32 1, %s499_s14 }
   0x6   : > { %p26_p0 = scmp.ge.s32.totalorder %s25_s20, 2  ;;  %p127_p1 = scmp.ne.s32.totalorder %s499_s14, %s495_s13 }
   0x7   : > { %p128_p2 = scmp.eq.s32.totalorder %s365_s18, 1  ;;  %p133_p3 = scmp.ne.s32.totalorder %s495_s13, %s491_s12 }
   0x8   : > { %s652_s20 = smov (%p26_p0, %s25_s20), 0  ;;  %p134_p5 = scmp.eq.s32.totalorder %s366_s19, 1 }
   0x9   : > { %p575_p4 = por %p128_p2, %p127_p1  ;;  %s113_s23 = ssub.s32 %s507_s16, %s652_s20 }
   0xa   : > { %p371_p6 = scmp.ge.s32.totalorder %s511_s17, 1  ;;  %p115_p7 = scmp.eq.s32.totalorder %s113_s23, 0 }
   0xb   : > { %p582_p8 = por %p134_p5, %p133_p3  ;;  %p177_p9 = scmp.lt.s32.totalorder %s511_s17, 3 }
   0xc   : > { %s588_s25 = scalar_select %p115_p7, %s499_s14, %s117_s21  }
   0xd   : > { %p178_p10 = pnand %p371_p6, %p177_p9 }
   0xe   : > { %p214_p11 = scmp.lt.s32.totalorder (!%p178_p10), %s503_s15, 1  ;;  %s209_s4 = sand.u32 (!%p178_p10), 1, %s495_s13  }
   0xf   : > { %181 = sbr.rel (%p178_p10) target bundleno = 165 (0xa5), region = 32  ;;  %s372_s6 = sshll.u32 (!%p178_p10), %s209_s4, 3 }
  0x10   : > { %s375_s10 = sshll.u32 (!%p178_p10), %s503_s15, 7  ;;  %s211_s11 = scalar_lea.vmem (!%p178_p10), [#allocation2], %s372_s6 }
  0x11   : > { %s260_s18 = sshll.u32 (!%p178_p10), %s211_s11, 4  ;;  %s258_s23 = scalar_lea.hbm (!%p178_p10), %s643_s3, %s375_s10  ;;  %s261_s18 = int_to_ptr.vmem [resolvable:$true] %s260_s18 }
  0x12   : > { %s245_s26 = scalar_lea.sflag (!%p178_p10), [#allocation3], %s209_s4  ;;  %s435_s27 = scalar_lea.vmem (!%p178_p10), %s261_s18, 128 }
  0x13   : > { %p436_p12 = scmp.ne.s32.totalorder (!%p178_p10), %s261_s18, %s435_s27  ;;  %s514_s28 = smov (!%p178_p10), [#allocation2]  }
  0x14   : > { %v229_v0 = vld [vmem:[%s641_s1] sm:$0xff]  ;;  %v513_v1 = vmov 0   ;;  %s215_s30 = scalar_select %p214_p11, %s503_s15, 1 }
  0x15   : > { %434 = vset.pattern.permute.xlu0 %v513_v1  ;;  %v236_v2 = vld [vmem:[%s642_s2] sm:$0xff]  ;;  %p437_p13 = pnand %p436_p12, %p575_p4  ;;  %s439_s29 = sshll.u32 %s514_s28, 4  ;;  %s440_s29 = int_to_ptr.vmem [resolvable:$false] %s439_s29 }
  0x16   : > { %232 = vperm.xlu0 %434, %v229_v0   ;;  %s373_s5 = sshll.u32 %s215_s30, 3  ;;  %s441_s15 = scalar_lea.vmem %s440_s29, 256 }
  0x17   : > { %s219_s9 = scalar_lea.vmem %s640_s0, %s373_s5  ;;  %p438_p0 = pneg %p437_p13 }
  0x18   : > { %v228_v4 = vld [vmem:[%s219_s9] sm:$0xff]  ;;  %p442_p1 = scmp.lt.s32.totalorder %s261_s18, %s440_s29  ;;  %p443_p2 = scmp.lt.s32.totalorder %s441_s15, %s435_s27 }
  0x1a   : > { %239 = vperm.xlu0 %434, %v236_v2   ;;  %p444_p3 = por %p443_p2, %p442_p1 }
  0x1c   : > { %p445_p5 = pnand %p444_p3, %p438_p0 }
  0x91   : > { %v233_v3 = vpop.permute.xlu0 %232 }
  0x92   : > { %v235_v5 = vsub.f32 %v228_v4, %v233_v3 }
  0x95   : > { %v240_v6 = vpop.permute.xlu0 %239 }
  0x96   : > { %v242_v7 = vmul.f32 %v240_v6, %v235_v5 }
  0x98   : > { %243 = vst [vmem:[%s211_s11] sm:$0xff] %v242_v7 }
  0x99   : > { %448 = shalt.err (!%p445_p5)
}
  0x9a   : > { %s449_s30 = scalar_lea.hbm %s258_s23, 128  ;;  %s453_s6 = scalar_lea.hbm %s643_s3, 256 }
  0x9b   : > { %p450_p6 = scmp.ne.s32.totalorder %s258_s23, %s449_s30  ;;  %p454_p10 = scmp.lt.s32.totalorder %s258_s23, %s643_s3 }
  0x9c   : > { %p455_p11 = scmp.lt.s32.totalorder %s453_s6, %s449_s30 }
  0x9d   : > { %p451_p7 = pnand %p450_p6, %p575_p4 }
  0x9e   : > { %p456_p12 = por %p455_p11, %p454_p10 }
  0x9f   : > { %p452_p9 = pneg %p451_p7 }
  0xa1   : > { %p457_p13 = pnand %p456_p12, %p452_p9 }
  0xa3   : > { %460 = shalt.err (!%p457_p13)
}
  0xa4   : > { %378 = dma.vmem_to_hbm [thread:$0]  (%p575_p4), %s261_s18, 128, %s258_s23, %s245_s26  }
  0xa5 PF: > { %p384_p0 = scmp.ge.s32.totalorder %s511_s17, 2  ;;  %s272_s9 = sand.u32 1, %s491_s12  }
  0xa6   : > { %s273_s10 = scalar_lea.sflag [#allocation3], %s272_s9 }
  0xa7   : > { %p381_p1 = pnand %p384_p0, %p582_p8 }
  0xa9   : > { %p382_p2 = pneg %p381_p1 }
  0xab   : > { %486 = dma.done.wait (%p382_p2), %s273_s10, 128  }
  0xac   : > { %488 = vsyncadd (%p382_p2), %s273_s10, 4294967168  ;;  %s16_s17 = sadd.s32 1, %s511_s17   ;;  %s646_s12 = smov %s495_s13 }
  0xad   : > { %p13_p3 = scmp.ge.s32.totalorder %s16_s17, 4   ;;  %s647_s13 = smov %s499_s14 }
  0xae   : > { %s648_s14 = smov %s588_s25  ;;  %s649_s15 = smov %s507_s16 }
  0xaf   : > { %s650_s16 = smov %s652_s20  ;;  %15 = sbr.rel (!%p13_p3) target bundleno = 4 (0x4), region = 73 }
  0xb4   :  { %278 = vsyncpa [#allocation3], 1 }
  0xb5   :  { %280 = vsyncpa [#allocation3 + $0x1], 1 }

</bundles_post_ra>
